<compile_context>
chip_gen: v5e
topology: v5e:2x2
jax: 0.10.0
libtpu: 0.0.40
codegen_flags: <defaults>
</compile_context>

<pallas_src>
import jax
import jax.numpy as jnp
from jax import lax
from jax.experimental import pallas as pl
from jax.experimental.pallas import tpu as pltpu
import numpy as np

_LANES = 128


def _reg_loss_kernel(feat_ref, rows_ref, lanes_ref, mask_ref, tgt_ref,
                     out_ref, pred_acc):
    chunk = pl.program_id(1)
    nchunks = pl.num_programs(1)

    @pl.when(chunk == 0)
    def _():
        pred_acc[...] = jnp.zeros_like(pred_acc)

    feat = feat_ref[...]            # (BT, RPC, 128)  native dtype feature rows
    rows = rows_ref[...]            # (BT, 1, Kp) int32: global 128-wide row index
    lanes = lanes_ref[...]          # (BT, 1, Kp) int32: lane within that row

    bt, rpc, _ = feat.shape
    kp = lanes.shape[-1]

    # Level 1 (MXU): per-k lane extraction.  cols[b, r, k] = feat[b, r, lanes[b,k]].
    lane_oh = (lax.broadcasted_iota(jnp.int32, (bt, _LANES, kp), 1) == lanes
               ).astype(feat.dtype)                                     # (BT,128,Kp)
    cols = jnp.einsum('brl,blk->brk', feat, lane_oh,
                      preferred_element_type=jnp.float32,
                      precision=lax.Precision.HIGHEST)                  # (BT,RPC,Kp)

    # Level 2 (VPU/XLU): pick the row rows[b,k] of this chunk (global indexing),
    # fused compare+select, reduce over sublanes, accumulate across chunks.
    gidx = lax.broadcasted_iota(jnp.int32, (bt, rpc, kp), 1) + chunk * rpc
    row_sel = gidx == rows                                              # (BT,RPC,Kp)
    pred_acc[...] += jnp.sum(jnp.where(row_sel, cols, 0.0),
                             axis=1, keepdims=True)                     # (BT,1,Kp)

    @pl.when(chunk == nchunks - 1)
    def _():
        m = mask_ref[...]           # (BT, 1, Kp) f32 (0/1; padded K entries are 0)
        tgt = tgt_ref[...]          # (BT, 1, Kp) f32
        # Masked smooth-L1 (beta = 1, sum reduction). Masked-out entries -> diff=0,
        # matching smooth_l1(pred*mask, target*mask).
        diff = (pred_acc[...] - tgt) * m
        ad = jnp.abs(diff)
        elem = jnp.where(ad < 1.0, 0.5 * ad * ad, ad - 0.5)
        loss_b = jnp.sum(elem, axis=2, keepdims=True)                   # (BT,1,1)
        num_b = jnp.sum(m, axis=2, keepdims=True)                       # (BT,1,1)
        # Pack (loss, num) into one lane-dense row: lane 0 = loss, lane 1 = num.
        lane = lax.broadcasted_iota(jnp.int32, (bt, 1, _LANES), 2)
        out_ref[...] = jnp.where(lane == 0, loss_b,
                                 jnp.where(lane == 1, num_b, 0.0))


def _pick_bt(b, max_bt):
    """Largest divisor of b that is <= max_bt, preferring >= 2 grid steps."""
    divs = [d for d in range(1, min(b, max_bt) + 1) if b % d == 0]
    good = [d for d in divs if b // d >= 2]
    return max(good) if good else max(divs)


def reg_loss_pallas(output_nchw, mask, ind, target, *,
                    max_bt=8, max_rows_per_chunk=1024):
    """output_nchw: [B,C,H,W], mask: [B,K], ind: [B,K] int, target: [B,K,1]."""
    B, C, H, W = output_nchw.shape
    N = C * H * W
    K = ind.shape[1]

    # --- Index remap instead of transposing the feature map --------------------
    # `ind` indexes the (h, w, c)-flattened permuted map: idx = (h*W + w)*C + c.
    # Remap to the (c, h, w)-flat order of the untouched NCHW tensor, and split
    # into (row, lane) of the 128-lane view here (tiny [B,K] integer ops).
    ind = ind.astype(jnp.int32)
    c_idx = ind % C
    hw_idx = ind // C                           # = h*W + w
    ind_nchw = c_idx * (H * W) + hw_idx         # (B, K)
    rows = ind_nchw // _LANES
    lanes = ind_nchw % _LANES

    # --- Pad K to a lane multiple (tiny host-side arrays only) -----------------
    Kp = pl.cdiv(K, _LANES) * _LANES
    pad_k = Kp - K
    mask_f = mask.astype(jnp.float32)
    tgt_f = target.astype(jnp.float32).reshape(B, K)
    if pad_k:
        rows = jnp.pad(rows, ((0, 0), (0, pad_k)))
        lanes = jnp.pad(lanes, ((0, 0), (0, pad_k)))
        mask_f = jnp.pad(mask_f, ((0, 0), (0, pad_k)))
        tgt_f = jnp.pad(tgt_f, ((0, 0), (0, pad_k)))
    rows3 = rows.reshape(B, 1, Kp)
    lanes3 = lanes.reshape(B, 1, Kp)
    mask3 = mask_f.reshape(B, 1, Kp)
    tgt3 = tgt_f.reshape(B, 1, Kp)

    # --- Feature map: free reshape into 128-lane rows, native dtype ------------
    feat = output_nchw.reshape(B, N)
    if N % _LANES != 0:
        # TODO(synk): lane-align C*H*W upstream; this pad is a full HBM round trip.
        n_pad = pl.cdiv(N, _LANES) * _LANES
        feat = jnp.pad(feat, ((0, 0), (0, n_pad - N)))
        N = n_pad
    nrows = N // _LANES
    feat = feat.reshape(B, nrows, _LANES)

    # --- Grid: (batch blocks [parallel], row chunks [arbitrary, innermost]) ----
    bt = _pick_bt(B, max_bt)
    nb = B // bt
    if nrows <= max_rows_per_chunk:
        rpc = nrows                         # single chunk: full-extent row dim
    else:
        rpc = max_rows_per_chunk            # multiple of 8 (sublane-aligned)
    nchunks = pl.cdiv(nrows, rpc)

    out = pl.pallas_call(
        _reg_loss_kernel,
        out_shape=jax.ShapeDtypeStruct((B, 1, _LANES), jnp.float32),
        grid_spec=pltpu.PrefetchScalarGridSpec(
            num_scalar_prefetch=0,
            grid=(nb, nchunks),
            in_specs=[
                pl.BlockSpec((bt, rpc, _LANES), lambda b, r: (b, r, 0)),
                pl.BlockSpec((bt, 1, Kp), lambda b, r: (b, 0, 0)),
                pl.BlockSpec((bt, 1, Kp), lambda b, r: (b, 0, 0)),
                pl.BlockSpec((bt, 1, Kp), lambda b, r: (b, 0, 0)),
                pl.BlockSpec((bt, 1, Kp), lambda b, r: (b, 0, 0)),
            ],
            out_specs=pl.BlockSpec((bt, 1, _LANES), lambda b, r: (b, 0, 0)),
            scratch_shapes=[pltpu.VMEM((bt, 1, Kp), jnp.float32)],
        ),
        compiler_params=pltpu.CompilerParams(
            dimension_semantics=("parallel", "arbitrary")),
    )(feat, rows3, lanes3, mask3, tgt3)

    # Final (global) reduction + normalization: a handful of scalars, plain JAX.
    loss = jnp.sum(out[:, 0, 0])
    num = jnp.sum(out[:, 0, 1])
    return loss / (num + 1e-4)


def reg_loss_ref(output_nchw, mask, ind, target):
    """Pure-JAX reference mirroring the PyTorch code."""
    B, C, H, W = output_nchw.shape
    feat = jnp.transpose(output_nchw, (0, 2, 3, 1)).reshape(B, -1, 1)
    pred = jnp.take_along_axis(feat, ind[:, :, None].astype(jnp.int32), axis=1)
    num = mask.astype(jnp.float32).sum()
    m = mask.astype(jnp.float32)[:, :, None]
    regr = pred * m
    gt = target * m
    d = jnp.abs(regr - gt)
    l = jnp.where(d < 1.0, 0.5 * d * d, d - 0.5)
    return jnp.sum(l) / (num + 1e-4)


if __name__ == "__main__":
    key = jax.random.PRNGKey(0)
    k1, k2, k3, k4 = jax.random.split(key, 4)

    B, C, H, W, K = 2, 4, 16, 16, 8
    N = C * H * W

    output = jax.random.normal(k1, (B, C, H, W), dtype=jnp.float32)
    ind = jax.random.randint(k2, (B, K), 0, N, dtype=jnp.int32)
    mask = (jax.random.uniform(k3, (B, K)) > 0.3).astype(jnp.float32)
    target = jax.random.normal(k4, (B, K, 1), dtype=jnp.float32)

    loss = reg_loss_pallas(output, mask, ind, target)
    jax.block_until_ready(loss)

    loss_ref = reg_loss_ref(output, mask, ind, target)
    np.testing.assert_allclose(np.asarray(loss), np.asarray(loss_ref),
                               rtol=1e-5, atol=1e-5)

    print("KERNEL_OK")
</pallas_src>

<mosaic_0001>
module attributes {stable_mosaic.version = 11 : i64} {
  func.func @_reg_loss_kernel(%arg0: i32, %arg1: i32, %arg2: memref<1x8x128xf32, #tpu.memory_space<vmem>>, %arg3: memref<1x1x128xi32, #tpu.memory_space<vmem>>, %arg4: memref<1x1x128xi32, #tpu.memory_space<vmem>>, %arg5: memref<1x1x128xf32, #tpu.memory_space<vmem>>, %arg6: memref<1x1x128xf32, #tpu.memory_space<vmem>>, %arg7: memref<1x1x128xf32, #tpu.memory_space<vmem>>, %arg8: memref<1x1x128xf32, #tpu.memory_space<vmem>>) attributes {dimension_semantics = [#tpu.dimension_semantics<parallel>, #tpu.dimension_semantics<arbitrary>], iteration_bounds = array<i64: 2, 1>, scalar_prefetch = 0 : i64, scratch_operands = 1 : i64, tpu.core_type = #tpu.core_type<tc>, window_params = [{transform_indices = @transform_0, window_bounds = array<i64: 1, 8, 128>}, {transform_indices = @transform_1, window_bounds = array<i64: 1, 1, 128>}, {transform_indices = @transform_2, window_bounds = array<i64: 1, 1, 128>}, {transform_indices = @transform_3, window_bounds = array<i64: 1, 1, 128>}, {transform_indices = @transform_4, window_bounds = array<i64: 1, 1, 128>}, {transform_indices = @transform_5, window_bounds = array<i64: 1, 1, 128>}]} {
    %c0_i32 = arith.constant 0 : i32
    %0 = arith.cmpi eq, %arg1, %c0_i32 : i32
    %1 = arith.extui %0 : i1 to i32
    %c0_i32_0 = arith.constant 0 : i32
    %2 = arith.cmpi ne, %1, %c0_i32_0 : i32
    scf.if %2 {
      %cst_19 = arith.constant 0.000000e+00 : f32
      %28 = vector.broadcast %cst_19 : f32 to vector<1x1x128xf32>
      %c0_20 = arith.constant 0 : index
      %c0_21 = arith.constant 0 : index
      %c0_22 = arith.constant 0 : index
      %29 = vector.load %arg8[%c0_20, %c0_21, %c0_22] : memref<1x1x128xf32, #tpu.memory_space<vmem>>, vector<1x1x128xf32>
      tpu.vector_store %arg8[%c0_20, %c0_21, %c0_22], %28 {strides = array<i32>} : memref<1x1x128xf32, #tpu.memory_space<vmem>>, vector<1x1x128xf32>,
    } else {
    }
    %c0 = arith.constant 0 : index
    %c0_1 = arith.constant 0 : index
    %c0_2 = arith.constant 0 : index
    %3 = vector.load %arg2[%c0, %c0_1, %c0_2] : memref<1x8x128xf32, #tpu.memory_space<vmem>>, vector<1x8x128xf32>
    %c0_3 = arith.constant 0 : index
    %c0_4 = arith.constant 0 : index
    %c0_5 = arith.constant 0 : index
    %4 = vector.load %arg3[%c0_3, %c0_4, %c0_5] : memref<1x1x128xi32, #tpu.memory_space<vmem>>, vector<1x1x128xi32>
    %c0_6 = arith.constant 0 : index
    %c0_7 = arith.constant 0 : index
    %c0_8 = arith.constant 0 : index
    %5 = vector.load %arg4[%c0_6, %c0_7, %c0_8] : memref<1x1x128xi32, #tpu.memory_space<vmem>>, vector<1x1x128xi32>
    %6 = tpu.iota {dimensions = array<i32: 1>} : vector<1x128x128xi32>
    %7 = vector.broadcast %5 : vector<1x1x128xi32> to vector<1x128x128xi32>
    %8 = arith.cmpi eq, %6, %7 : vector<1x128x128xi32>
    %9 = arith.extui %8 : vector<1x128x128xi1> to vector<1x128x128xi32>
    %10 = arith.sitofp %9 : vector<1x128x128xi32> to vector<1x128x128xf32>
    "tpu.trace_start"() <{level = 10 : i32, message = "brl,blk->brk"}> : () -> ()
    %cst = arith.constant dense<0.000000e+00> : vector<1x8x128xf32>
    %11 = tpu.matmul %3, %10, %cst {dimension_numbers = #tpu.dot_dimension_numbers<[2], [1], [1], [2], [0, 0, 0, 1, 1, 2], [0], [0]>, precision = #tpu.contract_precision<fp32>} : vector<1x8x128xf32>, vector<1x128x128xf32>, vector<1x8x128xf32> -> vector<1x8x128xf32>
    "tpu.trace_stop"() : () -> ()
    %12 = tpu.iota {dimensions = array<i32: 1>} : vector<1x8x128xi32>
    %c8_i32 = arith.constant 8 : i32
    %13 = arith.muli %arg1, %c8_i32 : i32
    %14 = vector.broadcast %13 : i32 to vector<1x8x128xi32>
    %15 = arith.addi %12, %14 : vector<1x8x128xi32>
    %16 = vector.broadcast %4 : vector<1x1x128xi32> to vector<1x8x128xi32>
    %17 = arith.cmpi eq, %15, %16 : vector<1x8x128xi32>
    %c0_9 = arith.constant 0 : index
    %c0_10 = arith.constant 0 : index
    %c0_11 = arith.constant 0 : index
    %18 = vector.load %arg8[%c0_9, %c0_10, %c0_11] : memref<1x1x128xf32, #tpu.memory_space<vmem>>, vector<1x1x128xf32>
    %cst_12 = arith.constant 0.000000e+00 : f32
    %19 = vector.broadcast %cst_12 : f32 to vector<1x8x128xf32>
    %20 = arith.select %17, %11, %19 : vector<1x8x128xi1>, vector<1x8x128xf32>
    %cst_13 = arith.constant dense<0.000000e+00> : vector<1x128xf32>
    %21 = vector.multi_reduction <add>, %20, %cst_13 [1] : vector<1x8x128xf32> to vector<1x128xf32>
    %22 = vector.shape_cast %21 : vector<1x128xf32> to vector<1x1x128xf32>
    %23 = arith.addf %18, %22 : vector<1x1x128xf32>
    %c0_14 = arith.constant 0 : index
    %c0_15 = arith.constant 0 : index
    %c0_16 = arith.constant 0 : index
    %24 = vector.load %arg8[%c0_14, %c0_15, %c0_16] : memref<1x1x128xf32, #tpu.memory_space<vmem>>, vector<1x1x128xf32>
    tpu.vector_store %arg8[%c0_14, %c0_15, %c0_16], %23 {strides = array<i32>} : memref<1x1x128xf32, #tpu.memory_space<vmem>>, vector<1x1x128xf32>,
    %c0_i32_17 = arith.constant 0 : i32
    %25 = arith.cmpi eq, %arg1, %c0_i32_17 : i32
    %26 = arith.extui %25 : i1 to i32
    %c0_i32_18 = arith.constant 0 : i32
    %27 = arith.cmpi ne, %26, %c0_i32_18 : i32
    scf.if %27 {
      %c0_19 = arith.constant 0 : index
      %c0_20 = arith.constant 0 : index
      %c0_21 = arith.constant 0 : index
      %28 = vector.load %arg5[%c0_19, %c0_20, %c0_21] : memref<1x1x128xf32, #tpu.memory_space<vmem>>, vector<1x1x128xf32>
      %c0_22 = arith.constant 0 : index
      %c0_23 = arith.constant 0 : index
      %c0_24 = arith.constant 0 : index
      %29 = vector.load %arg6[%c0_22, %c0_23, %c0_24] : memref<1x1x128xf32, #tpu.memory_space<vmem>>, vector<1x1x128xf32>
      %c0_25 = arith.constant 0 : index
      %c0_26 = arith.constant 0 : index
      %c0_27 = arith.constant 0 : index
      %30 = vector.load %arg8[%c0_25, %c0_26, %c0_27] : memref<1x1x128xf32, #tpu.memory_space<vmem>>, vector<1x1x128xf32>
      %31 = arith.subf %30, %29 : vector<1x1x128xf32>
      %32 = arith.mulf %31, %28 : vector<1x1x128xf32>
      %33 = math.absf %32 : vector<1x1x128xf32>
      %cst_28 = arith.constant 1.000000e+00 : f32
      %34 = vector.broadcast %cst_28 : f32 to vector<1x1x128xf32>
      %35 = arith.cmpf olt, %33, %34 : vector<1x1x128xf32>
      %cst_29 = arith.constant 5.000000e-01 : f32
      %36 = vector.broadcast %cst_29 : f32 to vector<1x1x128xf32>
      %37 = arith.mulf %36, %33 : vector<1x1x128xf32>
      %38 = arith.mulf %37, %33 : vector<1x1x128xf32>
      %cst_30 = arith.constant 5.000000e-01 : f32
      %39 = vector.broadcast %cst_30 : f32 to vector<1x1x128xf32>
      %40 = arith.subf %33, %39 : vector<1x1x128xf32>
      %41 = arith.select %35, %38, %40 : vector<1x1x128xi1>, vector<1x1x128xf32>
      %cst_31 = arith.constant dense<0.000000e+00> : vector<1x1xf32>
      %42 = vector.multi_reduction <add>, %41, %cst_31 [2] : vector<1x1x128xf32> to vector<1x1xf32>
      %43 = vector.shape_cast %42 : vector<1x1xf32> to vector<1x1x1xf32>
      %cst_32 = arith.constant dense<0.000000e+00> : vector<1x1xf32>
      %44 = vector.multi_reduction <add>, %28, %cst_32 [2] : vector<1x1x128xf32> to vector<1x1xf32>
      %45 = vector.shape_cast %44 : vector<1x1xf32> to vector<1x1x1xf32>
      %46 = tpu.iota {dimensions = array<i32: 2>} : vector<1x1x128xi32>
      %c0_i32_33 = arith.constant 0 : i32
      %47 = vector.broadcast %c0_i32_33 : i32 to vector<1x1x128xi32>
      %48 = arith.cmpi eq, %46, %47 : vector<1x1x128xi32>
      %c1_i32 = arith.constant 1 : i32
      %49 = vector.broadcast %c1_i32 : i32 to vector<1x1x128xi32>
      %50 = arith.cmpi eq, %46, %49 : vector<1x1x128xi32>
      %cst_34 = arith.constant 0.000000e+00 : f32
      %51 = vector.shape_cast %45 : vector<1x1x1xf32> to vector<1x1x1xf32>
      %52 = vector.broadcast %51 : vector<1x1x1xf32> to vector<1x1x128xf32>
      %53 = vector.broadcast %cst_34 : f32 to vector<1x1x128xf32>
      %54 = arith.select %50, %52, %53 : vector<1x1x128xi1>, vector<1x1x128xf32>
      %55 = vector.shape_cast %43 : vector<1x1x1xf32> to vector<1x1x1xf32>
      %56 = vector.broadcast %55 : vector<1x1x1xf32> to vector<1x1x128xf32>
      %57 = arith.select %48, %56, %54 : vector<1x1x128xi1>, vector<1x1x128xf32>
      %c0_35 = arith.constant 0 : index
      %c0_36 = arith.constant 0 : index
      %c0_37 = arith.constant 0 : index
      %58 = vector.load %arg7[%c0_35, %c0_36, %c0_37] : memref<1x1x128xf32, #tpu.memory_space<vmem>>, vector<1x1x128xf32>
      tpu.vector_store %arg7[%c0_35, %c0_36, %c0_37], %57 {strides = array<i32>} : memref<1x1x128xf32, #tpu.memory_space<vmem>>, vector<1x1x128xf32>,
    } else {
    }
    return
  }
  func.func @transform_0(%arg0: i32, %arg1: i32) -> (i32, i32, i32) {
    %c0_i32 = arith.constant 0 : i32
    %c0_i32_0 = arith.constant 0 : i32
    return %arg0, %arg1, %c0_i32 : i32, i32, i32
  }
  func.func @transform_1(%arg0: i32, %arg1: i32) -> (i32, i32, i32) {
    %c0_i32 = arith.constant 0 : i32
    %c0_i32_0 = arith.constant 0 : i32
    %c0_i32_1 = arith.constant 0 : i32
    return %arg0, %c0_i32, %c0_i32_0 : i32, i32, i32
  }
  func.func @transform_2(%arg0: i32, %arg1: i32) -> (i32, i32, i32) {
    %c0_i32 = arith.constant 0 : i32
    %c0_i32_0 = arith.constant 0 : i32
    %c0_i32_1 = arith.constant 0 : i32
    return %arg0, %c0_i32, %c0_i32_0 : i32, i32, i32
  }
  func.func @transform_3(%arg0: i32, %arg1: i32) -> (i32, i32, i32) {
    %c0_i32 = arith.constant 0 : i32
    %c0_i32_0 = arith.constant 0 : i32
    %c0_i32_1 = arith.constant 0 : i32
    return %arg0, %c0_i32, %c0_i32_0 : i32, i32, i32
  }
  func.func @transform_4(%arg0: i32, %arg1: i32) -> (i32, i32, i32) {
    %c0_i32 = arith.constant 0 : i32
    %c0_i32_0 = arith.constant 0 : i32
    %c0_i32_1 = arith.constant 0 : i32
    return %arg0, %c0_i32, %c0_i32_0 : i32, i32, i32
  }
  func.func @transform_5(%arg0: i32, %arg1: i32) -> (i32, i32, i32) {
    %c0_i32 = arith.constant 0 : i32
    %c0_i32_0 = arith.constant 0 : i32
    %c0_i32_1 = arith.constant 0 : i32
    return %arg0, %c0_i32, %c0_i32_0 : i32, i32, i32
  }
}

</mosaic_0001>

<bundles_post_ra>
// kernel: tpu_custom_call.1
= control target key start
LH: loop header
LB: loop body
LE: loop exit
PB: predicated region body
PF: predicated region fallthrough
CT: control target
= control target key end

     0   :  { %s2055_s0 = inlined_call_operand.hbm [shape: f32[2,8,128], index: 0, kind: input, shape index: {}]   ;;  %s2056_s1 = inlined_call_operand.hbm [shape: s32[2,1,128], index: 1, kind: input, shape index: {}]   ;;  %s2057_s2 = inlined_call_operand.hbm [shape: s32[2,1,128], index: 2, kind: input, shape index: {}]   ;;  %s2058_s3 = inlined_call_operand.vmem [shape: f32[2,1,128], index: 3, kind: input, shape index: {}]   ;;  %s2059_s4 = inlined_call_operand.hbm [shape: f32[2,1,128], index: 4, kind: input, shape index: {}]   ;;  %s2060_s5 = inlined_call_operand.hbm [shape: f32[2,1,128], index: 5, kind: output, shape index: {}]  }
   0x1   :  { %2065 = sst [smem:[#allocation20_spill]] %s2055_s0 }
   0x2   :  { %2066 = sst [smem:[#allocation21_spill]] %s2056_s1 }
   0x3   :  { %10 = vsyncpa [#allocation4], 0 }
   0x4   :  { %12 = vsyncpa [#allocation4 + $0x1], 0 }
   0x5   :  { %13 = vsyncpa [#allocation7], 0 }
   0x6   :  { %15 = vsyncpa [#allocation7 + $0x1], 0 }
   0x7   :  { %16 = vsyncpa [#allocation10], 0 }
   0x8   :  { %18 = vsyncpa [#allocation10 + $0x1], 0 }
   0x9   :  { %19 = vsyncpa [#allocation5], 0 }
   0xa   :  { %21 = vsyncpa [#allocation5 + $0x1], 0  ;;  %s1381_s18 = smov 0   ;;  %s1383_s19 = smov 0  }
   0xb   :  { %s1385_s20 = smov 0   ;;  %s1387_s21 = smov 0  }
   0xc   :  { %s1389_s22 = smov 0   ;;  %s1391_s23 = smov 0  }
   0xd LB: > { %2067 = sst [smem:[#allocation16_spill]] %s1335_s20  ;;  %s1412_s24 = sadd.s32 4294967295, %s1347_s23   ;;  %s1347_s23 = sphi %s1391_s23, %s27_s23   ;;  %s1343_s22 = sphi %s1389_s22, %s2086_s22   ;;  %s1339_s21 = sphi %s1387_s21, %s2085_s21   ;;  %s1335_s20 = sphi %s1385_s20, %s2081_s20   ;;  %s1331_s19 = sphi %s1383_s19, %s2084_s19   ;;  %s1327_s18 = sphi %s1381_s18, %s2083_s18  }
   0xe   : > { %2068 = sst [smem:[#allocation17_spill]] %s1347_s23  ;;  %s982_s25 = sadd.s32 4294967294, %s1347_s23  }
   0xf   : > { %s39_s26 = sadd.s32 1, %s1343_s22  ;;  %s48_s27 = sadd.s32 1, %s1335_s20 }
  0x10   : > { %p41_p0 = scmp.ge.s32.totalorder %s39_s26, 2  ;;  %p55_p1 = scmp.ne.s32.totalorder %s1335_s20, %s1331_s19 }
  0x11   : > { %p56_p2 = scmp.eq.s32.totalorder %s1347_s23, 0  ;;  %p61_p3 = scmp.ne.s32.totalorder %s1331_s19, %s1327_s18 }
  0x12   : > { %s2088_s26 = smov (%p41_p0, %s39_s26), 0  ;;  %p62_p5 = scmp.eq.s32.totalorder %s1412_s24, 0 }
  0x13   : > { %2069 = sst [smem:[#allocation18_spill]] %s2088_s26  ;;  %p1424_p4 = por %p56_p2, %p55_p1 }
  0x14   : > { %s43_s29 = ssub.s32 %s1343_s22, %s2088_s26  ;;  %p189_p6 = scmp.eq.s32.totalorder %s1412_s24, 1 }
  0x15   : > { %p46_p7 = scmp.eq.s32.totalorder %s43_s29, 0  ;;  %p1432_p8 = por %p62_p5, %p61_p3 }
  0x16   : > { %p1436_p9 = por %p189_p6, %p55_p1  ;;  %p195_p10 = scmp.eq.s32.totalorder %s982_s25, 1 }
  0x17   : > { %s1441_s7 = scalar_select %p46_p7, %s1335_s20, %s48_s27  }
  0x18   : > { %p1443_p11 = por %p195_p10, %p61_p3  ;;  %p984_p12 = scmp.ge.s32.totalorder %s1347_s23, 2 }
  0x19   : > { %2073 = sst [smem:[#allocation19_spill]] %s1441_s7  ;;  %p1083_p13 = scmp.lt.s32.totalorder %s1347_s23, 2 }
  0x1a   : > { %s1450_s9 = sand.u32 1, %s1335_s20   ;;  %s235_s10 = sand.u32 1, %s1347_s23  }
  0x1b   : > { %p1455_p0 = pnand %p1083_p13, %p1424_p4  ;;  %s2076_s1 = sld [smem:[#allocation21_spill]] }
  0x1c   : > { %s238_s15 = scalar_lea.vmem [#allocation6], %s1450_s9  ;;  %s236_s25 = scalar_lea.sflag [#allocation7], %s235_s10 }
  0x1d   : > { %s245_s16 = sshll.u32 %s238_s15, 4  ;;  %p987_p1 = scmp.ge.s32.totalorder %s1347_s23, 1  ;;  %s246_s16 = int_to_ptr.vmem [resolvable:$true] %s245_s16 }
  0x1e   : > { %p290_p2 = scmp.lt.s32.totalorder %s1347_s23, 3  ;;  %s985_s28 = sshll.u32 %s1450_s9, 3 }
  0x1f   : > { %s986_s29 = sshll.u32 %s1343_s22, 3  ;;  %s2078_s0 = sld [smem:[#allocation20_spill]] }
  0x20   : > { %p1468_p3 = pnand %p987_p1, %p290_p2  ;;  %s219_s10 = scalar_lea.vmem [#allocation3], %s985_s28 }
  0x21   : > { %s241_s14 = scalar_lea.hbm %s2076_s1, %s1343_s22  ;;  %s228_s1 = sshll.u32 %s219_s10, 4  ;;  %s229_s1 = int_to_ptr.vmem [resolvable:$true] %s228_s1 }
  0x22   : > { %s243_s17 = sshll.u32 %s241_s14, 4  ;;  %s258_s7 = scalar_lea.hbm %s2057_s2, %s1343_s22  ;;  %s244_s17 = int_to_ptr.hbm [resolvable:$true] %s243_s17 }
  0x23   : > { %1072 = dma.hbm_to_vmem [thread:$0]  (!%p1455_p0), %s244_s17, 16, %s246_s16, %s236_s25  }
  0x24   : > { %s216_s16 = scalar_lea.sflag [#allocation4], %s1450_s9  ;;  %s260_s20 = sshll.u32 %s258_s7, 4  ;;  %s261_s20 = int_to_ptr.hbm [resolvable:$true] %s260_s20 }
  0x25   : > { %s224_s14 = scalar_lea.hbm %s2078_s0, %s986_s29  ;;  %s255_s23 = scalar_lea.vmem [#allocation8], %s1450_s9 }
  0x26   : > { %s226_s15 = sshll.u32 %s224_s14, 4  ;;  %s262_s12 = sshll.u32 %s255_s23, 4  ;;  %s227_s15 = int_to_ptr.hbm [resolvable:$true] %s226_s15  ;;  %s263_s12 = int_to_ptr.vmem [resolvable:$true] %s262_s12 }
  0x27   : > { %1069 = dma.hbm_to_vmem [thread:$0]  (!%p1455_p0), %s227_s15, 128, %s229_s1, %s216_s16  }
  0x28   : > { %1075 = dma.hbm_to_vmem [thread:$0]  (!%p1455_p0), %s261_s20, 16, %s263_s12, %s236_s25  }
  0x29   : > { %s281_s13 = scalar_lea.hbm %s2059_s4, %s1343_s22  ;;  %s278_s14 = scalar_lea.vmem [#allocation9], %s1450_s9 }
  0x2a   : > { %s285_s10 = sshll.u32 %s278_s14, 4  ;;  %s283_s0 = sshll.u32 %s281_s13, 4  ;;  %s286_s10 = int_to_ptr.vmem [resolvable:$true] %s285_s10  ;;  %s284_s0 = int_to_ptr.hbm [resolvable:$true] %s283_s0 }
  0x2b   : > { %s276_s1 = scalar_lea.sflag [#allocation10], %s1450_s9  ;;  %294 = sbr.rel (%p1468_p3) target bundleno = 418 (0x1a2), region = 40 }
  0x2c   : > { %1078 = dma.hbm_to_vmem [thread:$0]  (!%p1455_p0), %s284_s0, 16, %s286_s10, %s276_s1  }
  0x2d   : > { %s1498_s23 = sand.u32 (!%p1468_p3), 1, %s1331_s19  }
  0x2e   : > { %s988_s20 = sshll.u32 (!%p1468_p3), %s1498_s23, 3  ;;  %s297_s26 = scalar_lea.sflag (!%p1468_p3), [#allocation4], %s1498_s23 }
  0x2f   : > { %s1502_s7 = scalar_lea.vmem (!%p1468_p3), [#allocation3], %s988_s20 }
  0x30   : > { %1310 = dma.done.wait (%p1432_p8), %s297_s26, 128  }
  0x31   : > { %1312 = vsyncadd (%p1432_p8), %s297_s26, 4294967168  ;;  %s306_s0 = sand.u32 1, %s1412_s24   ;;  %s309_s11 = scalar_lea.vmem [#allocation6], %s1498_s23 }
  0x32   : > { %s307_s9 = scalar_lea.sflag [#allocation7], %s306_s0 }
  0x33   : > { %1314 = dma.done.wait (%p1432_p8), %s307_s9, 32  }
  0x34   : > { %1316 = vsyncadd (%p1432_p8), %s307_s9, 4294967264  ;;  %s318_s25 = scalar_lea.vmem [#allocation8], %s1498_s23  ;;  %s325_s27 = scalar_lea.sflag [#allocation10], %s1498_s23 }
  0x35   : > { %s327_s15 = scalar_lea.vmem [#allocation9], %s1498_s23 }
  0x36   : > { %1318 = dma.done.wait (%p1432_p8), %s325_s27, 16  }
  0x37   : > { %1320 = vsyncadd (%p1432_p8), %s325_s27, 4294967280  ;;  %v380_v0 = vlaneseq  ;;  %v1349_v1 = vmov 0.0   ;;  %v1543_v9 = vld [vmem:[%s318_s25] ss:$0 sm:$0xff]  ;;  %v1350_v16 = vmov 1.0   ;;  %p369_p4 = scmp.lt.s32.totalorder %s1339_s21, 1  ;;  %s839_s29 = scalar_lea.hbm %s2060_s5, %s1339_s21 }
  0x38   : > { %376 = vst [vmem:[#allocation2] sm:$0x1] %v1349_v1  ;;  %s368_s13 = scalar_lea.vmem [#allocation11], %s1498_s23  ;;  %s843_s10 = sshll.u32 %s839_s29, 4  ;;  %s844_s10 = int_to_ptr.hbm [resolvable:$true] %s843_s10 }
  0x39   : > { %v1523_v2 = vshrl.u32 %v380_v0, 7  ;;  %s370_s24 = scalar_select %p369_p4, %s1339_s21, 1 }
  0x3a   : > { %s841_s14 = sshll.u32 %s368_s13, 4  ;;  %s831_s1 = scalar_lea.sflag [#allocation5], %s1498_s23  ;;  %s842_s14 = int_to_ptr.vmem [resolvable:$true] %s841_s14 }
  0x3b   : > { %v1526_v3 = vadd.s32 120, %v1523_v2  ;;  %v1529_v4 = vadd.s32 112, %v1523_v2  ;;  %v1532_v5 = vadd.s32 104, %v1523_v2  ;;  %v1535_v6 = vadd.s32 96, %v1523_v2  ;;  %s371_s17 = scalar_lea.vmem %s2058_s3, %s370_s24  ;;  %s1271_s20 = sshra.s32 %s844_s10, 4  ;;  %s1272_s20 = int_to_ptr.hbm [resolvable:$true] %s1271_s20 }
  0x3c   : > { %v1538_v7 = vadd.s32 88, %v1523_v2  ;;  %v1541_v8 = vadd.s32 80, %v1523_v2  ;;  %v1546_v10 = vadd.s32 72, %v1523_v2  ;;  %v1549_v11 = vadd.s32 64, %v1523_v2  ;;  %s1273_s26 = scalar_lea.hbm %s1272_s20, 1  ;;  %s1277_s0 = scalar_lea.hbm %s2060_s5, 2 }
  0x3d   : > { %v1552_v12 = vadd.s32 56, %v1523_v2  ;;  %v1555_v13 = vadd.s32 48, %v1523_v2  ;;  %v1558_v14 = vadd.s32 40, %v1523_v2  ;;  %v1561_v15 = vadd.s32 32, %v1523_v2  ;;  %p1274_p5 = scmp.ne.s32.totalorder %s1272_s20, %s1273_s26  ;;  %p1278_p8 = scmp.lt.s32.totalorder %s1272_s20, %s2060_s5 }
  0x3e   : > { %vm413_vm0 = vcmp.eq.s32.totalorder %v1526_v3, %v1543_v9  ;;  %vm412_vm1 = vcmp.eq.s32.totalorder %v1529_v4, %v1543_v9  ;;  %vm411_vm2 = vcmp.eq.s32.totalorder %v1532_v5, %v1543_v9  ;;  %vm410_vm3 = vcmp.eq.s32.totalorder %v1535_v6, %v1543_v9  ;;  %v805_v5 = vld [vmem:[%s371_s17] sm:$0x1]  ;;  %p1279_p10 = scmp.lt.s32.totalorder %s1277_s0, %s1273_s26 }
  0x3f   : > { %1005 = vmatpush.msk.msra.mxu0 %vm413_vm0, %v1350_v16  ;;  %v1004_v17 = vsel %vm413_vm0, 1.0, %v1349_v1  ;;  %v1003_v18 = vsel %vm412_vm1, 1.0, %v1349_v1  ;;  %vm409_vm4 = vcmp.eq.s32.totalorder %v1538_v7, %v1543_v9  ;;  %v1002_v19 = vsel %vm411_vm2, 1.0, %v1349_v1  ;;  %1021 = vmatpush.msk.msra.mxu3 %vm413_vm0, %v1350_v16  ;;  %p1275_p6 = pnand %p1274_p5, %p1436_p9 }
  0x40   : > { %v1593_v20 = vsub.f32 %v1004_v17, %v1004_v17  ;;  %v1595_v21 = vsub.f32 %v1003_v18, %v1003_v18  ;;  %v1597_v22 = vsub.f32 %v1002_v19, %v1002_v19  ;;  %vm408_vm5 = vcmp.eq.s32.totalorder %v1541_v8, %v1543_v9  ;;  %p1280_p13 = por %p1279_p10, %p1278_p8 }
  0x41   : > { %1006 = vmatpush.msk.msra.mxu0 %vm412_vm1, %v1350_v16  ;;  %v1001_v23 = vsel %vm410_vm3, 1.0, %v1349_v1  ;;  %vm407_vm6 = vcmp.eq.s32.totalorder %v1546_v10, %v1543_v9  ;;  %v1000_v24 = vsel %vm409_vm4, 1.0, %v1349_v1  ;;  %v1616_v25 = vadd.s32 24, %v1523_v2  ;;  %1022 = vmatpush.msk.msra.mxu3 %vm412_vm1, %v1350_v16  ;;  %p1276_p7 = pneg %p1275_p6 }
  0x42   : > { %v489_v26 = vand.u32 4294901760, %v1593_v20  ;;  %v495_v27 = vand.u32 4294901760, %v1595_v21  ;;  %v501_v28 = vand.u32 4294901760, %v1597_v22  ;;  %v1625_v29 = vsub.f32 %v1001_v23, %v1001_v23  ;;  %590 = vmatpush.msra.mxu2 %v1593_v20 }
  0x43   : > { %1007 = vmatpush.msk.msra.mxu0 %vm411_vm2, %v1350_v16  ;;  %v1632_v30 = vsub.f32 %v1000_v24, %v1000_v24  ;;  %vm406_vm7 = vcmp.eq.s32.totalorder %v1549_v11, %v1543_v9  ;;  %v999_v31 = vsel %vm408_vm5, 1.0, %v1349_v1  ;;  %v998_v32 = vsel %vm407_vm6, 1.0, %v1349_v1  ;;  %1023 = vmatpush.msk.msra.mxu3 %vm411_vm2, %v1350_v16  ;;  %p1281_p0 = pnand %p1280_p13, %p1276_p7 }
  0x44   : > { %v490_v33 = vsub.f32 %v1593_v20, %v489_v26  ;;  %v496_v34 = vsub.f32 %v1595_v21, %v495_v27  ;;  %v502_v35 = vsub.f32 %v1597_v22, %v501_v28  ;;  %v507_v36 = vand.u32 4294901760, %v1625_v29  ;;  %593 = vmatpush.msra.mxu2 %v1595_v21 }
  0x45   : > { %1008 = vmatpush.msk.msra.mxu0 %vm410_vm3, %v1350_v16  ;;  %v513_v37 = vand.u32 4294901760, %v1632_v30  ;;  %v1664_v38 = vsub.f32 %v999_v31, %v999_v31  ;;  %vm405_vm8 = vcmp.eq.s32.totalorder %v1552_v12, %v1543_v9  ;;  %v1668_v39 = vsub.f32 %v998_v32, %v998_v32  ;;  %1024 = vmatpush.msk.msra.mxu3 %vm410_vm3, %v1350_v16 }
  0x46   : > { %v491_v40 = vand.u32 4294901760, %v490_v33  ;;  %v497_v41 = vand.u32 4294901760, %v496_v34  ;;  %v508_v42 = vsub.f32 %v1625_v29, %v507_v36  ;;  %596 = vmatpush.msra.mxu2 %v1597_v22  ;;  %v1679_v43 = vadd.s32 16, %v1523_v2  ;;  %v377_v33 = vld [vmem:[%s1502_s7] sm:$0xff] }
  0x47   : > { %1009 = vmatpush.msk.msra.mxu0 %vm409_vm4, %v1350_v16  ;;  %v519_v44 = vand.u32 4294901760, %v1664_v38  ;;  %v525_v45 = vand.u32 4294901760, %v1668_v39  ;;  %vm404_vm9 = vcmp.eq.s32.totalorder %v1555_v13, %v1543_v9  ;;  %v997_v46 = vsel %vm406_vm7, 1.0, %v1349_v1  ;;  %1025 = vmatpush.msk.msra.mxu3 %vm409_vm4, %v1350_v16  ;;  %v1136_v13 = vld [vmem:[%s309_s11] ss:$0 sm:$0xff] }
  0x48   : > { %492 = vmatpush.msra.mxu1 %v491_v40  ;;  %v503_v47 = vand.u32 4294901760, %v502_v35  ;;  %v514_v48 = vsub.f32 %v1632_v30, %v513_v37  ;;  %v1700_v49 = vsub.f32 %v997_v46, %v997_v46  ;;  %v996_v50 = vsel %vm405_vm8, 1.0, %v1349_v1  ;;  %599 = vmatpush.msra.mxu2 %v1625_v29 }
  0x49   : > { %1010 = vmatpush.msk.msra.mxu0 %vm408_vm5, %v1350_v16  ;;  %v520_v51 = vsub.f32 %v1664_v38, %v519_v44  ;;  %vm403_vm10 = vcmp.eq.s32.totalorder %v1558_v14, %v1543_v9  ;;  %v1716_v52 = vsub.f32 %v996_v50, %v996_v50  ;;  %v1719_v53 = vadd.s32 8, %v1523_v2  ;;  %1026 = vmatpush.msk.msra.mxu3 %vm408_vm5, %v1350_v16 }
  0x4a   : > { %498 = vmatpush.msra.mxu1 %v497_v41  ;;  %v509_v54 = vand.u32 4294901760, %v508_v42  ;;  %v531_v55 = vand.u32 4294901760, %v1700_v49  ;;  %vm402_vm11 = vcmp.eq.s32.totalorder %v1561_v15, %v1543_v9  ;;  %v995_v56 = vsel %vm404_vm9, 1.0, %v1349_v1  ;;  %602 = vmatpush.msra.mxu2 %v1632_v30 }
  0x4b   : > { %1011 = vmatpush.msk.msra.mxu0 %vm407_vm6, %v1350_v16  ;;  %v526_v57 = vsub.f32 %v1668_v39, %v525_v45  ;;  %v537_v58 = vand.u32 4294901760, %v1716_v52  ;;  %v1741_v59 = vsub.f32 %v995_v56, %v995_v56  ;;  %vm401_vm12 = vcmp.eq.s32.totalorder %v1616_v25, %v1543_v9  ;;  %1027 = vmatpush.msk.msra.mxu3 %vm407_vm6, %v1350_v16 }
  0x4c   : > { %504 = vmatpush.msra.mxu1 %v503_v47  ;;  %v515_v60 = vand.u32 4294901760, %v514_v48  ;;  %v994_v61 = vsel %vm403_vm10, 1.0, %v1349_v1  ;;  %v993_v62 = vsel %vm402_vm11, 1.0, %v1349_v1  ;;  %605 = vmatpush.msra.mxu2 %v1664_v38  ;;  %v521_v63 = vand.u32 4294901760, %v520_v51 }
  0x4d   : > { %1012 = vmatpush.msk.msra.mxu0 %vm406_vm7, %v1350_v16  ;;  %v543_v17 = vand.u32 4294901760, %v1741_v59  ;;  %v1763_v18 = vsub.f32 %v994_v61, %v994_v61  ;;  %vm400_vm13 = vcmp.eq.s32.totalorder %v1679_v43, %v1543_v9  ;;  %1028 = vmatpush.msk.msra.mxu3 %vm406_vm7, %v1350_v16  ;;  %v532_v19 = vsub.f32 %v1700_v49, %v531_v55 }
  0x4e   : > { %510 = vmatpush.msra.mxu1 %v509_v54  ;;  %v1774_v23 = vsub.f32 %v993_v62, %v993_v62  ;;  %vm399_vm14 = vcmp.eq.s32.totalorder %v1719_v53, %v1543_v9  ;;  %v992_v24 = vsel %vm401_vm12, 1.0, %v1349_v1  ;;  %608 = vmatpush.msra.mxu2 %v1668_v39  ;;  %v527_v31 = vand.u32 4294901760, %v526_v57 }
  0x4f   : > { %1013 = vmatpush.msk.msra.mxu0 %vm405_vm8, %v1350_v16  ;;  %v538_v32 = vsub.f32 %v1716_v52, %v537_v58  ;;  %1029 = vmatpush.msk.msra.mxu3 %vm405_vm8, %v1350_v16  ;;  %v549_v34 = vand.u32 4294901760, %v1763_v18  ;;  %v1796_v35 = vsub.f32 %v992_v24, %v992_v24  ;;  %vm398_vm15 = vcmp.eq.s32.totalorder %v1523_v2, %v1543_v9 }
  0x50   : > { %516 = vmatpush.msra.mxu1 %v515_v60  ;;  %v991_v40 = vsel %vm400_vm13, 1.0, %v1349_v1  ;;  %611 = vmatpush.msra.mxu2 %v1700_v49  ;;  %v544_v41 = vsub.f32 %v1741_v59, %v543_v17  ;;  %v990_v42 = vsel %vm399_vm14, 1.0, %v1349_v1  ;;  %v533_v46 = vand.u32 4294901760, %v532_v19 }
  0x51   : > { %1014 = vmatpush.msk.msra.mxu0 %vm404_vm9, %v1350_v16  ;;  %1030 = vmatpush.msk.msra.mxu3 %vm404_vm9, %v1350_v16  ;;  %v555_v47 = vand.u32 4294901760, %v1774_v23  ;;  %v1821_v48 = vsub.f32 %v991_v40, %v991_v40  ;;  %v1824_v50 = vand.u32 4294901760, %v377_v33  ;;  %v539_v51 = vand.u32 4294901760, %v538_v32 }
  0x52   : > { %522 = vmatpush.msra.mxu1 %v521_v63  ;;  %614 = vmatpush.msra.mxu2 %v1716_v52  ;;  %v989_v54 = vsel %vm398_vm15, 1.0, %v1349_v1  ;;  %v550_v56 = vsub.f32 %v1763_v18, %v549_v34  ;;  %v561_v57 = vand.u32 4294901760, %v1796_v35  ;;  %v1842_v60 = vsub.f32 %v990_v42, %v990_v42 }
  0x53   : > { %1015 = vmatpush.msk.msra.mxu0 %vm403_vm10, %v1350_v16  ;;  %1031 = vmatpush.msk.msra.mxu3 %vm403_vm10, %v1350_v16  ;;  %v479_v61 = vsub.f32 %v377_v33, %v1824_v50  ;;  %v545_v1 = vand.u32 4294901760, %v544_v41  ;;  %v556_v62 = vsub.f32 %v1774_v23, %v555_v47  ;;  %v567_v63 = vand.u32 4294901760, %v1821_v48 }
  0x54   : > { %528 = vmatpush.msra.mxu1 %v527_v31  ;;  %617 = vmatpush.msra.mxu2 %v1741_v59  ;;  %v1858_v19 = vsub.f32 %v989_v54, %v989_v54  ;;  %v551_v31 = vand.u32 4294901760, %v550_v56  ;;  %v562_v32 = vsub.f32 %v1796_v35, %v561_v57  ;;  %v573_v33 = vand.u32 4294901760, %v1842_v60 }
  0x55   : > { %1016 = vmatpush.msk.msra.mxu0 %vm402_vm11, %v1350_v16  ;;  %1032 = vmatpush.msk.msra.mxu3 %vm402_vm11, %v1350_v16  ;;  %v480_v24 = vand.u32 4294901760, %v479_v61  ;;  %v557_v41 = vand.u32 4294901760, %v556_v62  ;;  %v568_v42 = vsub.f32 %v1821_v48, %v567_v63 }
  0x56   : > { %534 = vmatpush.msra.mxu1 %v533_v46  ;;  %620 = vmatpush.msra.mxu2 %v1763_v18  ;;  %v579_v46 = vand.u32 4294901760, %v1858_v19  ;;  %v563_v54 = vand.u32 4294901760, %v562_v32  ;;  %v574_v56 = vsub.f32 %v1842_v60, %v573_v33 }
  0x57   : > { %1017 = vmatpush.msk.msra.mxu0 %vm401_vm12, %v1350_v16  ;;  %1033 = vmatpush.msk.msra.mxu3 %vm401_vm12, %v1350_v16  ;;  %v481_v40 = vsub.f32 %v479_v61, %v480_v24 }
  0x58   : > { %540 = vmatpush.msra.mxu1 %v539_v51  ;;  %623 = vmatpush.msra.mxu2 %v1774_v23  ;;  %v580_v62 = vsub.f32 %v1858_v19, %v579_v46 }
  0x59   : > { %1018 = vmatpush.msk.msra.mxu0 %vm400_vm13, %v1350_v16  ;;  %1034 = vmatpush.msk.msra.mxu3 %vm400_vm13, %v1350_v16  ;;  %v482_v51 = vand.u32 4294901760, %v481_v40 }
  0x5a   : > { %546 = vmatpush.msra.mxu1 %v545_v1  ;;  %626 = vmatpush.msra.mxu2 %v1796_v35  ;;  %v569_v1 = vand.u32 4294901760, %v568_v42  ;;  %v581_v32 = vand.u32 4294901760, %v580_v62 }
  0x5b   : > { %1019 = vmatpush.msk.msra.mxu0 %vm399_vm14, %v1350_v16  ;;  %1035 = vmatpush.msk.msra.mxu3 %vm399_vm14, %v1350_v16 }
  0x5c   : > { %552 = vmatpush.msra.mxu1 %v551_v31  ;;  %629 = vmatpush.msra.mxu2 %v1821_v48  ;;  %v575_v31 = vand.u32 4294901760, %v574_v56 }
  0x5d   : > { %1020 = vmatpush.msk.msra.mxu0 %vm398_vm15, %v1350_v16  ;;  %1036 = vmatpush.msk.msra.mxu3 %vm398_vm15, %v1350_v16 }
  0x5e   : > { %558 = vmatpush.msra.mxu1 %v557_v41  ;;  %632 = vmatpush.msra.mxu2 %v1842_v60 }
  0x5f   : > { %684 = vmatpush.msrb.mxu0 %v489_v26  ;;  %677 = vmatmul.f32.vlgmr.msra.gmra.mxu3 %v480_v24 }
  0x60   : > { %483 = vmatmul.f32.vlgmr.msra.gmra.mxu0 %v482_v51  ;;  %564 = vmatpush.msra.mxu1 %v563_v54 }
  0x61   : > { %688 = vmatpush.msrb.mxu0 %v495_v27  ;;  %635 = vmatpush.msra.mxu2 %v1858_v19 }
  0x62   : > { %570 = vmatpush.msra.mxu1 %v569_v1  ;;  %638 = vmatmul.f32.vlgmr.msra.gmra.mxu2 %v479_v61 }
  0x63   : > { %692 = vmatpush.msrb.mxu0 %v501_v28  ;;  %v792_v28 = vld [vmem:[#allocation2] sm:$0x1] }
  0x64   : > { %576 = vmatpush.msra.mxu1 %v575_v31 }
  0x65   : > { %696 = vmatpush.msrb.mxu0 %v507_v36  ;;  %v806_v36 = vld [vmem:[%s327_s15] sm:$0x1] }
  0x66   : > { %582 = vmatpush.msra.mxu1 %v581_v32 }
  0x67   : > { %700 = vmatpush.msrb.mxu0 %v513_v37  ;;  %584 = vmatmul.f32.vlgmr.msra.gmra.mxu1 %v1824_v50 }
  0x68   : > { %1037 = vmatpush.msk.msrb.mxu1 %vm413_vm0, %v1350_v16  ;;  %vm816_vm0 = vcmask 1040384  }
  0x69   : > { %704 = vmatpush.msrb.mxu0 %v519_v44  ;;  %v820_v7 = vsel %vm816_vm0, %v805_v5, 0.0 }
  0x6a   : > { %1038 = vmatpush.msk.msrb.mxu1 %vm412_vm1, %v1350_v16  ;;  %821 = vadd.xlane.f32.xlu0 %v820_v7  ;;  %vm791_vm1 = vcmp.eq.s32.totalorder %v1523_v2, %v1136_v13 }
  0x6b   : > { %708 = vmatpush.msrb.mxu0 %v525_v45 }
  0x6c   : > { %1039 = vmatpush.msk.msrb.mxu1 %vm411_vm2, %v1350_v16 }
  0x6d   : > { %712 = vmatpush.msrb.mxu0 %v531_v55  ;;  %v824_v55 = vand.u32 127, %v380_v0 }
  0x6e   : > { %1040 = vmatpush.msk.msrb.mxu1 %vm410_vm3, %v1350_v16 }
  0x6f   : > { %716 = vmatpush.msrb.mxu0 %v537_v58  ;;  %vm826_vm3 = vcmp.eq.s32.totalorder %v824_v55, 1 }
  0x70   : > { %1041 = vmatpush.msk.msrb.mxu1 %vm409_vm4, %v1350_v16  ;;  %vm825_vm4 = vcmp.eq.s32.totalorder %v824_v55, 0 }
  0x71   : > { %720 = vmatpush.msrb.mxu0 %v543_v17 }
  0x72   : > { %1042 = vmatpush.msk.msrb.mxu1 %vm408_vm5, %v1350_v16 }
  0x73   : > { %724 = vmatpush.msrb.mxu0 %v549_v34 }
  0x74   : > { %1043 = vmatpush.msk.msrb.mxu1 %vm407_vm6, %v1350_v16 }
  0x75   : > { %728 = vmatpush.msrb.mxu0 %v555_v47 }
  0x76   : > { %1044 = vmatpush.msk.msrb.mxu1 %vm406_vm7, %v1350_v16 }
  0x77   : > { %732 = vmatpush.msrb.mxu0 %v561_v57 }
  0x78   : > { %1045 = vmatpush.msk.msrb.mxu1 %vm405_vm8, %v1350_v16 }
  0x79   : > { %736 = vmatpush.msrb.mxu0 %v567_v63 }
  0x7a   : > { %1046 = vmatpush.msk.msrb.mxu1 %vm404_vm9, %v1350_v16 }
  0x7b   : > { %740 = vmatpush.msrb.mxu0 %v573_v33 }
  0x7c   : > { %1047 = vmatpush.msk.msrb.mxu1 %vm403_vm10, %v1350_v16 }
  0x7d   : > { %744 = vmatpush.msrb.mxu0 %v579_v46 }
  0x7e   : > { %1048 = vmatpush.msk.msrb.mxu1 %vm402_vm11, %v1350_v16  ;;  %746 = vmatmul.f32.vlgmr.msrb.gmra.mxu0 %v1824_v50 }
  0x80   : > { %1049 = vmatpush.msk.msrb.mxu1 %vm401_vm12, %v1350_v16 }
  0x82   : > { %1050 = vmatpush.msk.msrb.mxu1 %vm400_vm13, %v1350_v16 }
  0x84   : > { %1051 = vmatpush.msk.msrb.mxu1 %vm399_vm14, %v1350_v16 }
  0x86   : > { %1052 = vmatpush.msk.msrb.mxu1 %vm398_vm15, %v1350_v16 }
  0x87   : > { %783 = vmatmul.f32.vlgmr.msrb.gmra.mxu1 %v1824_v50 }
  0xdd   : > { %v484_v4 = vpop.f32.mrf.mxu0  ;;  %v822_v53 = vpop.xlane.xlu0 %821 }
  0xde   : > { %v827_v58 = vsel %vm826_vm3, %v822_v53, 0.0 }
  0xe2   : > { %v678_v10 = vpop.f32.mrf.mxu3 }
  0xe4   : > { %v585_v3 = vpop.f32.mrf.mxu1 }
  0xe5   : > { %v586_v6 = vadd.f32 %v585_v3, %v484_v4  ;;  %v639_v8 = vpop.f32.mrf.mxu2 }
  0xe7   : > { %v640_v9 = vadd.f32 %v639_v8, %v586_v6 }
  0xe9   : > { %v679_v11 = vadd.f32 %v678_v10, %v640_v9 }
  0xfb   : > { %v747_v12 = vpop.f32.mrf.mxu0 }
  0xfc   : > { %v748_v14 = vadd.f32 %v747_v12, %v679_v11 }
 0x104   : > { %v784_v15 = vpop.f32.mrf.mxu1 }
 0x105   : > { %v785_v16 = vadd.f32 %v784_v15, %v748_v14 }
 0x107   : > { %v793_v20 = vsel %vm791_vm1, %v785_v16, 0.0 }
 0x108   : > { %v794_v21 = vrot.slane %v793_v20, 4 }
 0x10a   : > { %v795_v22 = vadd.f32 %v794_v21, %v793_v20 }
 0x10c   : > { %v796_v25 = vrot.slane %v795_v22, 2 }
 0x10e   : > { %v797_v26 = vadd.f32 %v796_v25, %v795_v22 }
 0x110   : > { %v798_v27 = vrot.slane %v797_v26, 1 }
 0x112   : > { %v799_v29 = vadd.f32 %v798_v27, %v797_v26 }
 0x114   : > { %v800_v30 = vadd.f32 %v799_v29, %v792_v28 }
 0x116   : > { %801 = vst [vmem:[#allocation2] sm:$0x1] %v800_v30 }
 0x11d   : > { %v807_v37 = vld [vmem:[#allocation2] sm:$0x1] }
 0x11e   : > { %v808_v38 = vsub.f32 %v807_v37, %v806_v36 }
 0x120   : > { %v809_v39 = vmul.f32 %v808_v38, %v805_v5 }
 0x122   : > { %v810_v43 = vand.u32 2147483647, %v809_v39 }
 0x124   : > { %v812_v2 = vmul.f32 0.5, %v810_v43  ;;  %v1053_v45 = vadd.f32 -0.5, %v810_v43  ;;  %vm811_vm2 = vcmp.lt.f32.partialorder %v810_v43, 1.0 }
 0x126   : > { %v813_v44 = vmul.f32 %v812_v2, %v810_v43 }
 0x128   : > { %v815_v49 = vsel %vm811_vm2, %v813_v44, %v1053_v45 }
 0x129   : > { %v817_v52 = vsel %vm816_vm0, %v815_v49, 0.0 }
 0x12a   : > { %818 = vadd.xlane.f32.xlu0 %v817_v52 }
 0x19d   : > { %v819_v59 = vpop.xlane.xlu0 %818 }
 0x19e   : > { %v828_v17 = vsel %vm825_vm4, %v819_v59, %v827_v58 }
 0x19f   : > { %829 = vst [vmem:[%s368_s13] sm:$0x1] %v828_v17 }
 0x1a0   : > { %1284 = shalt.err (!%p1281_p0)
}
 0x1a1   : > { %1064 = dma.vmem_to_hbm [thread:$0]  (%p1436_p9), %s842_s14, 16, %s844_s10, %s831_s1  }
 0x1a2 PF: > { %s2079_s23 = sld [smem:[#allocation17_spill]]  ;;  %s855_s25 = sand.u32 1, %s1327_s18  }
 0x1a3   : > { %p1080_p1 = pnand %p984_p12, %p1443_p11  ;;  %s856_s27 = scalar_lea.sflag [#allocation5], %s855_s25 }
 0x1a5   : > { %p1081_p2 = pneg %p1080_p1 }
 0x1a7   : > { %1322 = dma.done.wait (%p1081_p2), %s856_s27, 16  }
 0x1a8   : > { %1324 = vsyncadd (%p1081_p2), %s856_s27, 4294967280  ;;  %s27_s23 = sadd.s32 1, %s2079_s23   ;;  %s2080_s15 = sld [smem:[#allocation16_spill]] }
 0x1a9   : > { %p24_p3 = scmp.ge.s32.totalorder %s27_s23, 4   ;;  %s2081_s20 = sld [smem:[#allocation19_spill]] }
 0x1aa   : > { %s2082_s6 = sld [smem:[#allocation18_spill]]  ;;  %s2083_s18 = smov %s1331_s19 }
 0x1ab   : > { %s2085_s21 = smov %s1343_s22 }
 0x1ac   :  { %26 = sbr.rel (!%p24_p3) target bundleno = 13 (0xd), region = 133 }
 0x1ae   : > { %s2084_s19 = smov %s2080_s15 }
 0x1b0   : > { %s2086_s22 = smov %s2082_s6 }
 0x1b1   :  { %861 = vsyncpa [#allocation4], 1 }
 0x1b2   :  { %863 = vsyncpa [#allocation4 + $0x1], 1 }
 0x1b3   :  { %864 = vsyncpa [#allocation7], 1 }
 0x1b4   :  { %866 = vsyncpa [#allocation7 + $0x1], 1 }
 0x1b5   :  { %867 = vsyncpa [#allocation10], 1 }
 0x1b6   :  { %869 = vsyncpa [#allocation10 + $0x1], 1 }
 0x1b7   :  { %870 = vsyncpa [#allocation5], 1 }
 0x1b8   :  { %872 = vsyncpa [#allocation5 + $0x1], 1 }

</bundles_post_ra>
